<compile_context>
chip_gen: v6e
topology: v6e:2x2x1
jax: 0.10.0
libtpu: 0.0.40
codegen_flags: <defaults>
</compile_context>

<pallas_src>
import math
from functools import partial

import jax
import jax.numpy as jnp
from jax.experimental import pallas as pl
from jax.experimental.pallas import tpu as pltpu


def _layernorm(x, w, b, eps=1e-5):
    mu = jnp.mean(x, axis=-1, keepdims=True)
    var = jnp.mean((x - mu) ** 2, axis=-1, keepdims=True)
    return (x - mu) * jax.lax.rsqrt(var + eps) * w + b


def _alibi_slopes(heads):
    # half of heads get 2**linspace(0,-8); the rest are nonspatial (slope 0)
    return jnp.concatenate(
        [2.0 ** jnp.linspace(0.0, -8.0, heads // 2),
         jnp.zeros((heads - heads // 2,))]).astype(jnp.float32)


def block_kernel(x_ref, in_ln_w_ref, in_ln_b_ref, w_in_ref,
                 smear_ref, factor_ref, slopes_ref,
                 w_out_ref, out_ln_w_ref, out_ln_b_ref,
                 o_ref, o_slab_ref, *, bt, l, heads, d_head):
    de = heads * d_head
    n = bt * l

    x = x_ref[...]                                            # (bt*l, d_model)

    # ---- sandwich LN (in) + fused in-projection: one big MXU matmul -------
    xn = _layernorm(x, in_ln_w_ref[...], in_ln_b_ref[...])
    h = jnp.dot(xn, w_in_ref[...], preferred_element_type=jnp.float32)  # (n, 4*de)
    # (q/s)·(k/s)/sqrt(dh) == (q * factor)·k, factor = exp(-2*log_s)/sqrt(dh);
    # apply the lane-broadcast factor to the whole q slab in one VPU pass.
    q = h[:, 0 * de:1 * de] * factor_ref[...]
    k = h[:, 1 * de:2 * de]
    v = h[:, 2 * de:3 * de]
    p = h[:, 3 * de:4 * de]

    # ---- smeared keys: ONE roll + ONE blend over the whole (n, de) slab ----
    # The flat roll wraps across sequence boundaries, but position-0 rows are
    # forced to k_prev == 0 anyway, matching F.pad(k, (0,0,1,-1)) semantics.
    sm = smear_ref[...]                                       # (1, de) lane-broadcast sigmoid
    k_prev = pltpu.roll(k, shift=1, axis=0).reshape(bt, l, de)
    pos = jax.lax.broadcasted_iota(jnp.int32, (bt, l, de), 1)
    k_prev = jnp.where(pos == 0, 0.0, k_prev)
    k3 = (1.0 - sm) * k.reshape(bt, l, de) + sm * k_prev      # (bt, l, de)
    q3 = q.reshape(bt, l, de)
    v3 = v.reshape(bt, l, de)

    # ---- ALiBi + causal bias generated in-kernel (no HBM mask tensor) ------
    row = jax.lax.broadcasted_iota(jnp.int32, (l, l), 0)
    col = jax.lax.broadcasted_iota(jnp.int32, (l, l), 1)
    causal = jnp.where(col > row, -1e10, 0.0).astype(jnp.float32)
    col_f = col.astype(jnp.float32)

    for hh in range(heads):                                   # heads is small -> unrolled
        sl = slice(hh * d_head, (hh + 1) * d_head)
        qh = q3[:, :, sl]
        kh = k3[:, :, sl]
        vh = v3[:, :, sl]
        logits = jnp.einsum("bid,bjd->bij", qh, kh,
                            preferred_element_type=jnp.float32)      # (bt, l, l)
        logits = logits + (slopes_ref[hh] * col_f + causal)[None]    # scalar from SMEM
        m = jnp.max(logits, axis=-1, keepdims=True)
        e = jnp.exp(logits - m)
        attn = e * pl.reciprocal(jnp.sum(e, axis=-1, keepdims=True), approx=True)
        oh = jnp.einsum("bij,bjd->bid", attn, vh,
                        preferred_element_type=jnp.float32)          # (bt, l, d_head)
        o_slab_ref[:, sl] = oh.reshape(n, d_head)             # slab write (no concat)

    # ---- SiLU gate, out-projection, sandwich LN (out) ----------------------
    gated = jax.nn.silu(p) * o_slab_ref[...]
    y = jnp.dot(gated, w_out_ref[...], preferred_element_type=jnp.float32)
    o_ref[...] = _layernorm(y, out_ln_w_ref[...], out_ln_b_ref[...])


def block_forward(x, params, *, heads, d_head, bt=None):
    b, l, d_model = x.shape
    de = heads * d_head

    # Host-side derived parameter tensors (constant per call):
    smear_vec = jnp.repeat(jax.nn.sigmoid(params["smear"]),
                           d_head)[None, :].astype(jnp.float32)          # (1, de)
    factor_vec = jnp.repeat(jnp.exp(-2.0 * params["log_scale"])
                            / math.sqrt(d_head),
                            d_head)[None, :].astype(jnp.float32)         # (1, de)
    slopes = _alibi_slopes(heads)                                        # (heads,)
    in_ln_w = params["in_ln_w"].reshape(1, d_model)
    in_ln_b = params["in_ln_b"].reshape(1, d_model)
    out_ln_w = params["out_ln_w"].reshape(1, d_model)
    out_ln_b = params["out_ln_b"].reshape(1, d_model)

    # Batch tile: aim for bt*l >= ~128 rows per grid step to fill the MXU.
    if bt is None:
        want = min(b, max(1, -(-128 // l)))                   # ceil(128/l), capped at b
        bt = b
        for cand in range(want, b + 1):
            if b % cand == 0:
                bt = cand
                break
    if bt != b and (bt * l) % 8 != 0:
        bt = b                                                # keep blocks sublane-aligned
    n_rows = bt * l

    x2 = x.reshape(b * l, d_model)                            # row-major => free in HBM
    kern = partial(block_kernel, bt=bt, l=l, heads=heads, d_head=d_head)

    out2 = pl.pallas_call(
        kern,
        out_shape=jax.ShapeDtypeStruct((b * l, d_model), jnp.float32),
        grid_spec=pltpu.PrefetchScalarGridSpec(
            num_scalar_prefetch=0,
            grid=(b // bt,),
            in_specs=[
                pl.BlockSpec((n_rows, d_model), lambda i: (i, 0)),      # x (flattened)
                pl.BlockSpec((1, d_model), lambda i: (0, 0)),           # in_ln w
                pl.BlockSpec((1, d_model), lambda i: (0, 0)),           # in_ln b
                pl.BlockSpec((d_model, 4 * de), lambda i: (0, 0)),      # in_proj W^T
                pl.BlockSpec((1, de), lambda i: (0, 0)),                # sigmoid(smear), lane-bcast
                pl.BlockSpec((1, de), lambda i: (0, 0)),                # q logits scale, lane-bcast
                pl.BlockSpec(memory_space=pltpu.MemorySpace.SMEM),      # per-head ALiBi slope
                pl.BlockSpec((de, d_model), lambda i: (0, 0)),          # out_proj W^T
                pl.BlockSpec((1, d_model), lambda i: (0, 0)),           # out_ln w
                pl.BlockSpec((1, d_model), lambda i: (0, 0)),           # out_ln b
            ],
            out_specs=pl.BlockSpec((n_rows, d_model), lambda i: (i, 0)),
            scratch_shapes=[pltpu.VMEM((n_rows, de), jnp.float32)],     # per-head output slab
        ),
        compiler_params=pltpu.CompilerParams(
            dimension_semantics=("parallel",),
            vmem_limit_bytes=32 * 1024 * 1024,
        ),
    )(x2, in_ln_w, in_ln_b, params["w_in"], smear_vec, factor_vec, slopes,
      params["w_out"], out_ln_w, out_ln_b)

    return out2.reshape(b, l, d_model)


def block_reference(x, params, *, heads, d_head):
    """Pure-JAX reference mirroring the PyTorch forward exactly."""
    b, l, d_model = x.shape
    de = heads * d_head
    xn = _layernorm(x, params["in_ln_w"], params["in_ln_b"])
    h = xn @ params["w_in"]
    q, k, v, p = jnp.split(h, 4, axis=-1)

    def to_heads(t):
        return t.reshape(b, l, heads, d_head).transpose(0, 2, 1, 3)     # b h i d

    q, k, v = map(to_heads, (q, k, v))
    smear = jax.nn.sigmoid(params["smear"])[None, :, None, None]
    k_prev = jnp.pad(k, ((0, 0), (0, 0), (1, 0), (0, 0)))[:, :, :l, :]
    k = (1.0 - smear) * k + smear * k_prev
    s = jnp.exp(params["log_scale"])[None, :, None, None]
    slopes = _alibi_slopes(heads)
    causal = jnp.triu(jnp.full((l, l), -1e10, jnp.float32), k=1)
    mask = (slopes[:, None, None]
            * jnp.arange(l, dtype=jnp.float32)[None, None, :] + causal[None])
    logits = jnp.einsum("bhid,bhjd->bhij", q / s, k / s) / math.sqrt(d_head)
    logits = logits + mask[None]
    attn = jax.nn.softmax(logits, axis=-1)
    o = jnp.einsum("bhij,bhjd->bhid", attn, v)
    o = o.transpose(0, 2, 1, 3).reshape(b, l, de)
    y = (jax.nn.silu(p) * o) @ params["w_out"]
    return _layernorm(y, params["out_ln_w"], params["out_ln_b"])


if __name__ == "__main__":
    # Config: depth=2, heads=4, d_model=32, expansion_factor=2 -> d_expanded=64, d_head=16
    depth, heads, d_model, expansion = 2, 4, 32, 2
    d_expanded = d_model * expansion
    d_head = d_expanded // heads
    b, l = 2, 8

    key = jax.random.PRNGKey(0)
    k_x, k_in, k_out = jax.random.split(key, 3)

    x = jax.random.normal(k_x, (b, l, d_model), dtype=jnp.float32)

    params = {
        "in_ln_w": jnp.ones((d_model,), jnp.float32),
        "in_ln_b": jnp.zeros((d_model,), jnp.float32),
        "out_ln_w": jnp.ones((d_model,), jnp.float32),
        "out_ln_b": jnp.zeros((d_model,), jnp.float32),
        # nn.Linear weight (4*de, d_model) passed transposed -> (d_model, 4*de)
        "w_in": 0.02 * jax.random.normal(k_in, (d_model, 4 * d_expanded), jnp.float32),
        # out_proj init: normal std = 0.02/sqrt(2*depth); torch (d_model, de) -> transposed
        "w_out": (0.02 / math.sqrt(2 * depth))
        * jax.random.normal(k_out, (d_expanded, d_model), jnp.float32),
        "smear": jnp.linspace(-6.0, 6.0, heads, dtype=jnp.float32),
        "log_scale": jnp.zeros((heads,), jnp.float32),
    }

    out = block_forward(x, params, heads=heads, d_head=d_head)
    out = jax.block_until_ready(out)

    ref = block_reference(x, params, heads=heads, d_head=d_head)
    assert out.shape == (b, l, d_model)
    # 2e-3 tolerance: the softmax denominator uses the EUP approximate reciprocal.
    assert jnp.allclose(out, ref, atol=2e-3, rtol=2e-3), "mismatch vs pure-JAX reference"

    print("KERNEL_OK")
</pallas_src>

<mosaic_0001>
module attributes {stable_mosaic.version = 11 : i64} {
  func.func @block_kernel(%arg0: i32, %arg1: memref<16x32xf32, #tpu.memory_space<vmem>>, %arg2: memref<1x32xf32, #tpu.memory_space<vmem>>, %arg3: memref<1x32xf32, #tpu.memory_space<vmem>>, %arg4: memref<32x256xf32, #tpu.memory_space<vmem>>, %arg5: memref<1x64xf32, #tpu.memory_space<vmem>>, %arg6: memref<1x64xf32, #tpu.memory_space<vmem>>, %arg7: memref<4xf32, #tpu.memory_space<smem>>, %arg8: memref<64x32xf32, #tpu.memory_space<vmem>>, %arg9: memref<1x32xf32, #tpu.memory_space<vmem>>, %arg10: memref<1x32xf32, #tpu.memory_space<vmem>>, %arg11: memref<16x32xf32, #tpu.memory_space<vmem>>, %arg12: memref<16x64xf32, #tpu.memory_space<vmem>>) attributes {dimension_semantics = [#tpu.dimension_semantics<parallel>], iteration_bounds = array<i64: 1>, scalar_prefetch = 0 : i64, scratch_operands = 1 : i64, tpu.core_type = #tpu.core_type<tc>, window_params = [{transform_indices = @transform_0, window_bounds = array<i64: 16, 32>}, {pipeline_mode = #tpu.pipeline_mode<synchronous>, transform_indices = @transform_1, window_bounds = array<i64: 1, 32>}, {pipeline_mode = #tpu.pipeline_mode<synchronous>, transform_indices = @transform_2, window_bounds = array<i64: 1, 32>}, {pipeline_mode = #tpu.pipeline_mode<synchronous>, transform_indices = @transform_3, window_bounds = array<i64: 32, 256>}, {pipeline_mode = #tpu.pipeline_mode<synchronous>, transform_indices = @transform_4, window_bounds = array<i64: 1, 64>}, {pipeline_mode = #tpu.pipeline_mode<synchronous>, transform_indices = @transform_5, window_bounds = array<i64: 1, 64>}, {transform_indices = @transform_6, window_bounds = array<i64: 4>}, {pipeline_mode = #tpu.pipeline_mode<synchronous>, transform_indices = @transform_7, window_bounds = array<i64: 64, 32>}, {pipeline_mode = #tpu.pipeline_mode<synchronous>, transform_indices = @transform_8, window_bounds = array<i64: 1, 32>}, {pipeline_mode = #tpu.pipeline_mode<synchronous>, transform_indices = @transform_9, window_bounds = array<i64: 1, 32>}, {transform_indices = @transform_10, window_bounds = array<i64: 16, 32>}]} {
    %c0 = arith.constant 0 : index
    %c0_0 = arith.constant 0 : index
    %0 = vector.load %arg1[%c0, %c0_0] : memref<16x32xf32, #tpu.memory_space<vmem>>, vector<16x32xf32>
    %c0_1 = arith.constant 0 : index
    %c0_2 = arith.constant 0 : index
    %1 = vector.load %arg2[%c0_1, %c0_2] : memref<1x32xf32, #tpu.memory_space<vmem>>, vector<1x32xf32>
    %c0_3 = arith.constant 0 : index
    %c0_4 = arith.constant 0 : index
    %2 = vector.load %arg3[%c0_3, %c0_4] : memref<1x32xf32, #tpu.memory_space<vmem>>, vector<1x32xf32>
    %cst = arith.constant dense<0.000000e+00> : vector<16xf32>
    %3 = vector.multi_reduction <add>, %0, %cst [1] : vector<16x32xf32> to vector<16xf32>
    %4 = vector.shape_cast %3 : vector<16xf32> to vector<16x1xf32>
    %cst_5 = arith.constant 3.200000e+01 : f32
    %5 = vector.broadcast %cst_5 : f32 to vector<16x1xf32>
    %6 = arith.divf %4, %5 : vector<16x1xf32>
    %7 = vector.broadcast %6 : vector<16x1xf32> to vector<16x32xf32>
    %8 = arith.subf %0, %7 : vector<16x32xf32>
    %9 = arith.mulf %8, %8 : vector<16x32xf32>
    %cst_6 = arith.constant dense<0.000000e+00> : vector<16xf32>
    %10 = vector.multi_reduction <add>, %9, %cst_6 [1] : vector<16x32xf32> to vector<16xf32>
    %11 = vector.shape_cast %10 : vector<16xf32> to vector<16x1xf32>
    %cst_7 = arith.constant 3.200000e+01 : f32
    %12 = vector.broadcast %cst_7 : f32 to vector<16x1xf32>
    %13 = arith.divf %11, %12 : vector<16x1xf32>
    %14 = vector.broadcast %6 : vector<16x1xf32> to vector<16x32xf32>
    %15 = arith.subf %0, %14 : vector<16x32xf32>
    %cst_8 = arith.constant 9.99999974E-6 : f32
    %16 = vector.broadcast %cst_8 : f32 to vector<16x1xf32>
    %17 = arith.addf %13, %16 : vector<16x1xf32>
    %18 = math.rsqrt %17 : vector<16x1xf32>
    %19 = vector.broadcast %18 : vector<16x1xf32> to vector<16x32xf32>
    %20 = arith.mulf %15, %19 : vector<16x32xf32>
    %21 = vector.broadcast %1 : vector<1x32xf32> to vector<16x32xf32>
    %22 = arith.mulf %20, %21 : vector<16x32xf32>
    %23 = vector.broadcast %2 : vector<1x32xf32> to vector<16x32xf32>
    %24 = arith.addf %22, %23 : vector<16x32xf32>
    %c0_9 = arith.constant 0 : index
    %c0_10 = arith.constant 0 : index
    %25 = vector.load %arg4[%c0_9, %c0_10] : memref<32x256xf32, #tpu.memory_space<vmem>>, vector<32x256xf32>
    %cst_11 = arith.constant dense<0.000000e+00> : vector<16x256xf32>
    %26 = tpu.matmul %24, %25, %cst_11 {dimension_numbers = #tpu.dot_dimension_numbers<[1], [0], [0], [1], [0, 0, 1, 1], [], []>} : vector<16x32xf32>, vector<32x256xf32>, vector<16x256xf32> -> vector<16x256xf32>
    %27 = vector.extract_strided_slice %26 {offsets = [0, 0], sizes = [16, 64], strides = [1, 1]} : vector<16x256xf32> to vector<16x64xf32>
    %c0_12 = arith.constant 0 : index
    %c0_13 = arith.constant 0 : index
    %28 = vector.load %arg6[%c0_12, %c0_13] : memref<1x64xf32, #tpu.memory_space<vmem>>, vector<1x64xf32>
    %29 = vector.broadcast %28 : vector<1x64xf32> to vector<16x64xf32>
    %30 = arith.mulf %27, %29 : vector<16x64xf32>
    %31 = vector.extract_strided_slice %26 {offsets = [0, 64], sizes = [16, 64], strides = [1, 1]} : vector<16x256xf32> to vector<16x64xf32>
    %32 = vector.extract_strided_slice %26 {offsets = [0, 128], sizes = [16, 64], strides = [1, 1]} : vector<16x256xf32> to vector<16x64xf32>
    %33 = vector.extract_strided_slice %26 {offsets = [0, 192], sizes = [16, 64], strides = [1, 1]} : vector<16x256xf32> to vector<16x64xf32>
    %c0_14 = arith.constant 0 : index
    %c0_15 = arith.constant 0 : index
    %34 = vector.load %arg5[%c0_14, %c0_15] : memref<1x64xf32, #tpu.memory_space<vmem>>, vector<1x64xf32>
    %c1_i32 = arith.constant 1 : i32
    %35 = tpu.dynamic_rotate %31 by %c1_i32 dim 0 : vector<16x64xf32>, i32 -> vector<16x64xf32>
    %36 = vector.shape_cast %35 : vector<16x64xf32> to vector<2x8x64xf32>
    %37 = tpu.iota {dimensions = array<i32: 1>} : vector<2x8x64xi32>
    %c0_i32 = arith.constant 0 : i32
    %38 = vector.broadcast %c0_i32 : i32 to vector<2x8x64xi32>
    %39 = arith.cmpi eq, %37, %38 : vector<2x8x64xi32>
    %cst_16 = arith.constant 0.000000e+00 : f32
    %40 = vector.broadcast %cst_16 : f32 to vector<2x8x64xf32>
    %41 = arith.select %39, %40, %36 : vector<2x8x64xi1>, vector<2x8x64xf32>
    %cst_17 = arith.constant 1.000000e+00 : f32
    %42 = vector.broadcast %cst_17 : f32 to vector<1x64xf32>
    %43 = arith.subf %42, %34 : vector<1x64xf32>
    %44 = vector.shape_cast %31 : vector<16x64xf32> to vector<2x8x64xf32>
    %45 = vector.shape_cast %43 : vector<1x64xf32> to vector<1x1x64xf32>
    %46 = vector.broadcast %45 : vector<1x1x64xf32> to vector<2x8x64xf32>
    %47 = arith.mulf %46, %44 : vector<2x8x64xf32>
    %48 = vector.shape_cast %34 : vector<1x64xf32> to vector<1x1x64xf32>
    %49 = vector.broadcast %48 : vector<1x1x64xf32> to vector<2x8x64xf32>
    %50 = arith.mulf %49, %41 : vector<2x8x64xf32>
    %51 = arith.addf %47, %50 : vector<2x8x64xf32>
    %52 = vector.shape_cast %30 : vector<16x64xf32> to vector<2x8x64xf32>
    %53 = vector.shape_cast %32 : vector<16x64xf32> to vector<2x8x64xf32>
    %54 = tpu.iota {dimensions = array<i32: 0>} : vector<8x8xi32>
    %55 = tpu.iota {dimensions = array<i32: 1>} : vector<8x8xi32>
    %56 = arith.cmpi sgt, %55, %54 : vector<8x8xi32>
    %cst_18 = arith.constant -1.000000e+10 : f32
    %cst_19 = arith.constant 0.000000e+00 : f32
    %57 = vector.broadcast %cst_18 : f32 to vector<8x8xf32>
    %58 = vector.broadcast %cst_19 : f32 to vector<8x8xf32>
    %59 = arith.select %56, %57, %58 : vector<8x8xi1>, vector<8x8xf32>
    %60 = arith.sitofp %55 : vector<8x8xi32> to vector<8x8xf32>
    %61 = vector.extract_strided_slice %52 {offsets = [0, 0, 0], sizes = [2, 8, 16], strides = [1, 1, 1]} : vector<2x8x64xf32> to vector<2x8x16xf32>
    %62 = vector.extract_strided_slice %51 {offsets = [0, 0, 0], sizes = [2, 8, 16], strides = [1, 1, 1]} : vector<2x8x64xf32> to vector<2x8x16xf32>
    %63 = vector.extract_strided_slice %53 {offsets = [0, 0, 0], sizes = [2, 8, 16], strides = [1, 1, 1]} : vector<2x8x64xf32> to vector<2x8x16xf32>
    "tpu.trace_start"() <{level = 10 : i32, message = "bid,bjd->bij"}> : () -> ()
    %cst_20 = arith.constant dense<0.000000e+00> : vector<2x8x8xf32>
    %64 = tpu.matmul %61, %62, %cst_20 {dimension_numbers = #tpu.dot_dimension_numbers<[2], [2], [1], [1], [0, 0, 0, 1, 1, 1], [0], [0]>} : vector<2x8x16xf32>, vector<2x8x16xf32>, vector<2x8x8xf32> -> vector<2x8x8xf32>
    "tpu.trace_stop"() : () -> ()
    %c0_21 = arith.constant 0 : index
    %65 = memref.load %arg7[%c0_21] : memref<4xf32, #tpu.memory_space<smem>>
    %66 = vector.broadcast %65 : f32 to vector<8x8xf32>
    %67 = arith.mulf %66, %60 : vector<8x8xf32>
    %68 = arith.addf %67, %59 : vector<8x8xf32>
    %69 = vector.shape_cast %68 : vector<8x8xf32> to vector<1x8x8xf32>
    %70 = vector.broadcast %69 : vector<1x8x8xf32> to vector<2x8x8xf32>
    %71 = arith.addf %64, %70 : vector<2x8x8xf32>
    %cst_22 = arith.constant dense<0xFF800000> : vector<2x8xf32>
    %72 = vector.multi_reduction <maximumf>, %71, %cst_22 [2] : vector<2x8x8xf32> to vector<2x8xf32>
    %73 = vector.shape_cast %72 : vector<2x8xf32> to vector<2x8x1xf32>
    %74 = vector.broadcast %73 : vector<2x8x1xf32> to vector<2x8x8xf32>
    %75 = arith.subf %71, %74 : vector<2x8x8xf32>
    %76 = math.exp %75 : vector<2x8x8xf32>
    %cst_23 = arith.constant dense<0.000000e+00> : vector<2x8xf32>
    %77 = vector.multi_reduction <add>, %76, %cst_23 [2] : vector<2x8x8xf32> to vector<2x8xf32>
    %78 = vector.shape_cast %77 : vector<2x8xf32> to vector<2x8x1xf32>
    %79 = tpu.reciprocal %78 {approx = true} : vector<2x8x1xf32> -> vector<2x8x1xf32>
    %80 = vector.broadcast %79 : vector<2x8x1xf32> to vector<2x8x8xf32>
    %81 = arith.mulf %76, %80 : vector<2x8x8xf32>
    "tpu.trace_start"() <{level = 10 : i32, message = "bij,bjd->bid"}> : () -> ()
    %cst_24 = arith.constant dense<0.000000e+00> : vector<2x8x16xf32>
    %82 = tpu.matmul %81, %63, %cst_24 {dimension_numbers = #tpu.dot_dimension_numbers<[2], [1], [1], [2], [0, 0, 0, 1, 1, 2], [0], [0]>} : vector<2x8x8xf32>, vector<2x8x16xf32>, vector<2x8x16xf32> -> vector<2x8x16xf32>
    "tpu.trace_stop"() : () -> ()
    %83 = vector.shape_cast %82 : vector<2x8x16xf32> to vector<16x16xf32>
    %c0_25 = arith.constant 0 : index
    %c0_26 = arith.constant 0 : index
    %84 = vector.load %arg12[%c0_25, %c0_26] : memref<16x64xf32, #tpu.memory_space<vmem>>, vector<16x16xf32>
    tpu.vector_store %arg12[%c0_25, %c0_26], %83 {strides = array<i32>} : memref<16x64xf32, #tpu.memory_space<vmem>>, vector<16x16xf32>,
    %85 = vector.extract_strided_slice %52 {offsets = [0, 0, 16], sizes = [2, 8, 16], strides = [1, 1, 1]} : vector<2x8x64xf32> to vector<2x8x16xf32>
    %86 = vector.extract_strided_slice %51 {offsets = [0, 0, 16], sizes = [2, 8, 16], strides = [1, 1, 1]} : vector<2x8x64xf32> to vector<2x8x16xf32>
    %87 = vector.extract_strided_slice %53 {offsets = [0, 0, 16], sizes = [2, 8, 16], strides = [1, 1, 1]} : vector<2x8x64xf32> to vector<2x8x16xf32>
    "tpu.trace_start"() <{level = 10 : i32, message = "bid,bjd->bij"}> : () -> ()
    %cst_27 = arith.constant dense<0.000000e+00> : vector<2x8x8xf32>
    %88 = tpu.matmul %85, %86, %cst_27 {dimension_numbers = #tpu.dot_dimension_numbers<[2], [2], [1], [1], [0, 0, 0, 1, 1, 1], [0], [0]>} : vector<2x8x16xf32>, vector<2x8x16xf32>, vector<2x8x8xf32> -> vector<2x8x8xf32>
    "tpu.trace_stop"() : () -> ()
    %c1 = arith.constant 1 : index
    %89 = memref.load %arg7[%c1] : memref<4xf32, #tpu.memory_space<smem>>
    %90 = vector.broadcast %89 : f32 to vector<8x8xf32>
    %91 = arith.mulf %90, %60 : vector<8x8xf32>
    %92 = arith.addf %91, %59 : vector<8x8xf32>
    %93 = vector.shape_cast %92 : vector<8x8xf32> to vector<1x8x8xf32>
    %94 = vector.broadcast %93 : vector<1x8x8xf32> to vector<2x8x8xf32>
    %95 = arith.addf %88, %94 : vector<2x8x8xf32>
    %cst_28 = arith.constant dense<0xFF800000> : vector<2x8xf32>
    %96 = vector.multi_reduction <maximumf>, %95, %cst_28 [2] : vector<2x8x8xf32> to vector<2x8xf32>
    %97 = vector.shape_cast %96 : vector<2x8xf32> to vector<2x8x1xf32>
    %98 = vector.broadcast %97 : vector<2x8x1xf32> to vector<2x8x8xf32>
    %99 = arith.subf %95, %98 : vector<2x8x8xf32>
    %100 = math.exp %99 : vector<2x8x8xf32>
    %cst_29 = arith.constant dense<0.000000e+00> : vector<2x8xf32>
    %101 = vector.multi_reduction <add>, %100, %cst_29 [2] : vector<2x8x8xf32> to vector<2x8xf32>
    %102 = vector.shape_cast %101 : vector<2x8xf32> to vector<2x8x1xf32>
    %103 = tpu.reciprocal %102 {approx = true} : vector<2x8x1xf32> -> vector<2x8x1xf32>
    %104 = vector.broadcast %103 : vector<2x8x1xf32> to vector<2x8x8xf32>
    %105 = arith.mulf %100, %104 : vector<2x8x8xf32>
    "tpu.trace_start"() <{level = 10 : i32, message = "bij,bjd->bid"}> : () -> ()
    %cst_30 = arith.constant dense<0.000000e+00> : vector<2x8x16xf32>
    %106 = tpu.matmul %105, %87, %cst_30 {dimension_numbers = #tpu.dot_dimension_numbers<[2], [1], [1], [2], [0, 0, 0, 1, 1, 2], [0], [0]>} : vector<2x8x8xf32>, vector<2x8x16xf32>, vector<2x8x16xf32> -> vector<2x8x16xf32>
    "tpu.trace_stop"() : () -> ()
    %107 = vector.shape_cast %106 : vector<2x8x16xf32> to vector<16x16xf32>
    %c0_31 = arith.constant 0 : index
    %c16 = arith.constant 16 : index
    %108 = vector.load %arg12[%c0_31, %c16] : memref<16x64xf32, #tpu.memory_space<vmem>>, vector<16x16xf32>
    tpu.vector_store %arg12[%c0_31, %c16], %107 {strides = array<i32>} : memref<16x64xf32, #tpu.memory_space<vmem>>, vector<16x16xf32>,
    %109 = vector.extract_strided_slice %52 {offsets = [0, 0, 32], sizes = [2, 8, 16], strides = [1, 1, 1]} : vector<2x8x64xf32> to vector<2x8x16xf32>
    %110 = vector.extract_strided_slice %51 {offsets = [0, 0, 32], sizes = [2, 8, 16], strides = [1, 1, 1]} : vector<2x8x64xf32> to vector<2x8x16xf32>
    %111 = vector.extract_strided_slice %53 {offsets = [0, 0, 32], sizes = [2, 8, 16], strides = [1, 1, 1]} : vector<2x8x64xf32> to vector<2x8x16xf32>
    "tpu.trace_start"() <{level = 10 : i32, message = "bid,bjd->bij"}> : () -> ()
    %cst_32 = arith.constant dense<0.000000e+00> : vector<2x8x8xf32>
    %112 = tpu.matmul %109, %110, %cst_32 {dimension_numbers = #tpu.dot_dimension_numbers<[2], [2], [1], [1], [0, 0, 0, 1, 1, 1], [0], [0]>} : vector<2x8x16xf32>, vector<2x8x16xf32>, vector<2x8x8xf32> -> vector<2x8x8xf32>
    "tpu.trace_stop"() : () -> ()
    %c2 = arith.constant 2 : index
    %113 = memref.load %arg7[%c2] : memref<4xf32, #tpu.memory_space<smem>>
    %114 = vector.broadcast %113 : f32 to vector<8x8xf32>
    %115 = arith.mulf %114, %60 : vector<8x8xf32>
    %116 = arith.addf %115, %59 : vector<8x8xf32>
    %117 = vector.shape_cast %116 : vector<8x8xf32> to vector<1x8x8xf32>
    %118 = vector.broadcast %117 : vector<1x8x8xf32> to vector<2x8x8xf32>
    %119 = arith.addf %112, %118 : vector<2x8x8xf32>
    %cst_33 = arith.constant dense<0xFF800000> : vector<2x8xf32>
    %120 = vector.multi_reduction <maximumf>, %119, %cst_33 [2] : vector<2x8x8xf32> to vector<2x8xf32>
    %121 = vector.shape_cast %120 : vector<2x8xf32> to vector<2x8x1xf32>
    %122 = vector.broadcast %121 : vector<2x8x1xf32> to vector<2x8x8xf32>
    %123 = arith.subf %119, %122 : vector<2x8x8xf32>
    %124 = math.exp %123 : vector<2x8x8xf32>
    %cst_34 = arith.constant dense<0.000000e+00> : vector<2x8xf32>
    %125 = vector.multi_reduction <add>, %124, %cst_34 [2] : vector<2x8x8xf32> to vector<2x8xf32>
    %126 = vector.shape_cast %125 : vector<2x8xf32> to vector<2x8x1xf32>
    %127 = tpu.reciprocal %126 {approx = true} : vector<2x8x1xf32> -> vector<2x8x1xf32>
    %128 = vector.broadcast %127 : vector<2x8x1xf32> to vector<2x8x8xf32>
    %129 = arith.mulf %124, %128 : vector<2x8x8xf32>
    "tpu.trace_start"() <{level = 10 : i32, message = "bij,bjd->bid"}> : () -> ()
    %cst_35 = arith.constant dense<0.000000e+00> : vector<2x8x16xf32>
    %130 = tpu.matmul %129, %111, %cst_35 {dimension_numbers = #tpu.dot_dimension_numbers<[2], [1], [1], [2], [0, 0, 0, 1, 1, 2], [0], [0]>} : vector<2x8x8xf32>, vector<2x8x16xf32>, vector<2x8x16xf32> -> vector<2x8x16xf32>
    "tpu.trace_stop"() : () -> ()
    %131 = vector.shape_cast %130 : vector<2x8x16xf32> to vector<16x16xf32>
    %c0_36 = arith.constant 0 : index
    %c32 = arith.constant 32 : index
    %132 = vector.load %arg12[%c0_36, %c32] : memref<16x64xf32, #tpu.memory_space<vmem>>, vector<16x16xf32>
    tpu.vector_store %arg12[%c0_36, %c32], %131 {strides = array<i32>} : memref<16x64xf32, #tpu.memory_space<vmem>>, vector<16x16xf32>,
    %133 = vector.extract_strided_slice %52 {offsets = [0, 0, 48], sizes = [2, 8, 16], strides = [1, 1, 1]} : vector<2x8x64xf32> to vector<2x8x16xf32>
    %134 = vector.extract_strided_slice %51 {offsets = [0, 0, 48], sizes = [2, 8, 16], strides = [1, 1, 1]} : vector<2x8x64xf32> to vector<2x8x16xf32>
    %135 = vector.extract_strided_slice %53 {offsets = [0, 0, 48], sizes = [2, 8, 16], strides = [1, 1, 1]} : vector<2x8x64xf32> to vector<2x8x16xf32>
    "tpu.trace_start"() <{level = 10 : i32, message = "bid,bjd->bij"}> : () -> ()
    %cst_37 = arith.constant dense<0.000000e+00> : vector<2x8x8xf32>
    %136 = tpu.matmul %133, %134, %cst_37 {dimension_numbers = #tpu.dot_dimension_numbers<[2], [2], [1], [1], [0, 0, 0, 1, 1, 1], [0], [0]>} : vector<2x8x16xf32>, vector<2x8x16xf32>, vector<2x8x8xf32> -> vector<2x8x8xf32>
    "tpu.trace_stop"() : () -> ()
    %c3 = arith.constant 3 : index
    %137 = memref.load %arg7[%c3] : memref<4xf32, #tpu.memory_space<smem>>
    %138 = vector.broadcast %137 : f32 to vector<8x8xf32>
    %139 = arith.mulf %138, %60 : vector<8x8xf32>
    %140 = arith.addf %139, %59 : vector<8x8xf32>
    %141 = vector.shape_cast %140 : vector<8x8xf32> to vector<1x8x8xf32>
    %142 = vector.broadcast %141 : vector<1x8x8xf32> to vector<2x8x8xf32>
    %143 = arith.addf %136, %142 : vector<2x8x8xf32>
    %cst_38 = arith.constant dense<0xFF800000> : vector<2x8xf32>
    %144 = vector.multi_reduction <maximumf>, %143, %cst_38 [2] : vector<2x8x8xf32> to vector<2x8xf32>
    %145 = vector.shape_cast %144 : vector<2x8xf32> to vector<2x8x1xf32>
    %146 = vector.broadcast %145 : vector<2x8x1xf32> to vector<2x8x8xf32>
    %147 = arith.subf %143, %146 : vector<2x8x8xf32>
    %148 = math.exp %147 : vector<2x8x8xf32>
    %cst_39 = arith.constant dense<0.000000e+00> : vector<2x8xf32>
    %149 = vector.multi_reduction <add>, %148, %cst_39 [2] : vector<2x8x8xf32> to vector<2x8xf32>
    %150 = vector.shape_cast %149 : vector<2x8xf32> to vector<2x8x1xf32>
    %151 = tpu.reciprocal %150 {approx = true} : vector<2x8x1xf32> -> vector<2x8x1xf32>
    %152 = vector.broadcast %151 : vector<2x8x1xf32> to vector<2x8x8xf32>
    %153 = arith.mulf %148, %152 : vector<2x8x8xf32>
    "tpu.trace_start"() <{level = 10 : i32, message = "bij,bjd->bid"}> : () -> ()
    %cst_40 = arith.constant dense<0.000000e+00> : vector<2x8x16xf32>
    %154 = tpu.matmul %153, %135, %cst_40 {dimension_numbers = #tpu.dot_dimension_numbers<[2], [1], [1], [2], [0, 0, 0, 1, 1, 2], [0], [0]>} : vector<2x8x8xf32>, vector<2x8x16xf32>, vector<2x8x16xf32> -> vector<2x8x16xf32>
    "tpu.trace_stop"() : () -> ()
    %155 = vector.shape_cast %154 : vector<2x8x16xf32> to vector<16x16xf32>
    %c0_41 = arith.constant 0 : index
    %c48 = arith.constant 48 : index
    %156 = vector.load %arg12[%c0_41, %c48] : memref<16x64xf32, #tpu.memory_space<vmem>>, vector<16x16xf32>
    tpu.vector_store %arg12[%c0_41, %c48], %155 {strides = array<i32>} : memref<16x64xf32, #tpu.memory_space<vmem>>, vector<16x16xf32>,
    %157 = arith.negf %33 : vector<16x64xf32>
    %158 = math.exp %157 : vector<16x64xf32>
    %cst_42 = arith.constant 1.000000e+00 : f32
    %159 = vector.broadcast %cst_42 : f32 to vector<16x64xf32>
    %160 = arith.addf %159, %158 : vector<16x64xf32>
    %161 = arith.divf %159, %160 : vector<16x64xf32>
    %162 = arith.mulf %33, %161 : vector<16x64xf32>
    %c0_43 = arith.constant 0 : index
    %c0_44 = arith.constant 0 : index
    %163 = vector.load %arg12[%c0_43, %c0_44] : memref<16x64xf32, #tpu.memory_space<vmem>>, vector<16x64xf32>
    %164 = arith.mulf %162, %163 : vector<16x64xf32>
    %c0_45 = arith.constant 0 : index
    %c0_46 = arith.constant 0 : index
    %165 = vector.load %arg8[%c0_45, %c0_46] : memref<64x32xf32, #tpu.memory_space<vmem>>, vector<64x32xf32>
    %cst_47 = arith.constant dense<0.000000e+00> : vector<16x32xf32>
    %166 = tpu.matmul %164, %165, %cst_47 {dimension_numbers = #tpu.dot_dimension_numbers<[1], [0], [0], [1], [0, 0, 1, 1], [], []>} : vector<16x64xf32>, vector<64x32xf32>, vector<16x32xf32> -> vector<16x32xf32>
    %c0_48 = arith.constant 0 : index
    %c0_49 = arith.constant 0 : index
    %167 = vector.load %arg9[%c0_48, %c0_49] : memref<1x32xf32, #tpu.memory_space<vmem>>, vector<1x32xf32>
    %c0_50 = arith.constant 0 : index
    %c0_51 = arith.constant 0 : index
    %168 = vector.load %arg10[%c0_50, %c0_51] : memref<1x32xf32, #tpu.memory_space<vmem>>, vector<1x32xf32>
    %cst_52 = arith.constant dense<0.000000e+00> : vector<16xf32>
    %169 = vector.multi_reduction <add>, %166, %cst_52 [1] : vector<16x32xf32> to vector<16xf32>
    %170 = vector.shape_cast %169 : vector<16xf32> to vector<16x1xf32>
    %cst_53 = arith.constant 3.200000e+01 : f32
    %171 = vector.broadcast %cst_53 : f32 to vector<16x1xf32>
    %172 = arith.divf %170, %171 : vector<16x1xf32>
    %173 = vector.broadcast %172 : vector<16x1xf32> to vector<16x32xf32>
    %174 = arith.subf %166, %173 : vector<16x32xf32>
    %175 = arith.mulf %174, %174 : vector<16x32xf32>
    %cst_54 = arith.constant dense<0.000000e+00> : vector<16xf32>
    %176 = vector.multi_reduction <add>, %175, %cst_54 [1] : vector<16x32xf32> to vector<16xf32>
    %177 = vector.shape_cast %176 : vector<16xf32> to vector<16x1xf32>
    %cst_55 = arith.constant 3.200000e+01 : f32
    %178 = vector.broadcast %cst_55 : f32 to vector<16x1xf32>
    %179 = arith.divf %177, %178 : vector<16x1xf32>
    %180 = vector.broadcast %172 : vector<16x1xf32> to vector<16x32xf32>
    %181 = arith.subf %166, %180 : vector<16x32xf32>
    %cst_56 = arith.constant 9.99999974E-6 : f32
    %182 = vector.broadcast %cst_56 : f32 to vector<16x1xf32>
    %183 = arith.addf %179, %182 : vector<16x1xf32>
    %184 = math.rsqrt %183 : vector<16x1xf32>
    %185 = vector.broadcast %184 : vector<16x1xf32> to vector<16x32xf32>
    %186 = arith.mulf %181, %185 : vector<16x32xf32>
    %187 = vector.broadcast %167 : vector<1x32xf32> to vector<16x32xf32>
    %188 = arith.mulf %186, %187 : vector<16x32xf32>
    %189 = vector.broadcast %168 : vector<1x32xf32> to vector<16x32xf32>
    %190 = arith.addf %188, %189 : vector<16x32xf32>
    %c0_57 = arith.constant 0 : index
    %c0_58 = arith.constant 0 : index
    %191 = vector.load %arg11[%c0_57, %c0_58] : memref<16x32xf32, #tpu.memory_space<vmem>>, vector<16x32xf32>
    tpu.vector_store %arg11[%c0_57, %c0_58], %190 {strides = array<i32>} : memref<16x32xf32, #tpu.memory_space<vmem>>, vector<16x32xf32>,
    return
  }
  func.func @transform_0(%arg0: i32) -> (i32, i32) {
    %c0_i32 = arith.constant 0 : i32
    %c0_i32_0 = arith.constant 0 : i32
    return %arg0, %c0_i32 : i32, i32
  }
  func.func @transform_1(%arg0: i32) -> (i32, i32) {
    %c0_i32 = arith.constant 0 : i32
    %c0_i32_0 = arith.constant 0 : i32
    %c0_i32_1 = arith.constant 0 : i32
    return %c0_i32, %c0_i32_0 : i32, i32
  }
  func.func @transform_2(%arg0: i32) -> (i32, i32) {
    %c0_i32 = arith.constant 0 : i32
    %c0_i32_0 = arith.constant 0 : i32
    %c0_i32_1 = arith.constant 0 : i32
    return %c0_i32, %c0_i32_0 : i32, i32
  }
  func.func @transform_3(%arg0: i32) -> (i32, i32) {
    %c0_i32 = arith.constant 0 : i32
    %c0_i32_0 = arith.constant 0 : i32
    %c0_i32_1 = arith.constant 0 : i32
    return %c0_i32, %c0_i32_0 : i32, i32
  }
  func.func @transform_4(%arg0: i32) -> (i32, i32) {
    %c0_i32 = arith.constant 0 : i32
    %c0_i32_0 = arith.constant 0 : i32
    %c0_i32_1 = arith.constant 0 : i32
    return %c0_i32, %c0_i32_0 : i32, i32
  }
  func.func @transform_5(%arg0: i32) -> (i32, i32) {
    %c0_i32 = arith.constant 0 : i32
    %c0_i32_0 = arith.constant 0 : i32
    %c0_i32_1 = arith.constant 0 : i32
    return %c0_i32, %c0_i32_0 : i32, i32
  }
  func.func @transform_6(%arg0: i32) -> i32 {
    %c0_i32 = arith.constant 0 : i32
    %c0_i32_0 = arith.constant 0 : i32
    return %c0_i32 : i32
  }
  func.func @transform_7(%arg0: i32) -> (i32, i32) {
    %c0_i32 = arith.constant 0 : i32
    %c0_i32_0 = arith.constant 0 : i32
    %c0_i32_1 = arith.constant 0 : i32
    return %c0_i32, %c0_i32_0 : i32, i32
  }
  func.func @transform_8(%arg0: i32) -> (i32, i32) {
    %c0_i32 = arith.constant 0 : i32
    %c0_i32_0 = arith.constant 0 : i32
    %c0_i32_1 = arith.constant 0 : i32
    return %c0_i32, %c0_i32_0 : i32, i32
  }
  func.func @transform_9(%arg0: i32) -> (i32, i32) {
    %c0_i32 = arith.constant 0 : i32
    %c0_i32_0 = arith.constant 0 : i32
    %c0_i32_1 = arith.constant 0 : i32
    return %c0_i32, %c0_i32_0 : i32, i32
  }
  func.func @transform_10(%arg0: i32) -> (i32, i32) {
    %c0_i32 = arith.constant 0 : i32
    %c0_i32_0 = arith.constant 0 : i32
    return %arg0, %c0_i32 : i32, i32
  }
}

</mosaic_0001>

<bundles_post_ra>
// kernel: tpu_custom_call.1
= control target key start
LH: loop header
LB: loop body
LE: loop exit
PB: predicated region body
PF: predicated region fallthrough
CT: control target
= control target key end

     0   :  { %15 = vsyncpa [#allocation5], 0  ;;  %s2399_s0 = inlined_call_operand.vmem [shape: f32[16,32], index: 0, kind: input, shape index: {}]   ;;  %s2400_s1 = inlined_call_operand.vmem [shape: f32[1,32], index: 1, kind: input, shape index: {}]   ;;  %s2401_s2 = inlined_call_operand.vmem [shape: f32[1,32], index: 2, kind: input, shape index: {}]   ;;  %s2402_s3 = inlined_call_operand.vmem [shape: f32[32,256], index: 3, kind: input, shape index: {}]   ;;  %s2403_s4 = inlined_call_operand.vmem [shape: f32[1,64], index: 4, kind: input, shape index: {}]   ;;  %s2404_s5 = inlined_call_operand.vmem [shape: f32[1,64], index: 5, kind: input, shape index: {}]   ;;  %s2405_s6 = inlined_call_operand.vmem [shape: f32[4], index: 6, kind: input, shape index: {}]   ;;  %s2406_s7 = inlined_call_operand.vmem [shape: f32[64,32], index: 7, kind: input, shape index: {}]   ;;  %s2407_s8 = inlined_call_operand.vmem [shape: f32[1,32], index: 8, kind: input, shape index: {}]   ;;  %s2408_s9 = inlined_call_operand.vmem [shape: f32[1,32], index: 9, kind: input, shape index: {}]   ;;  %s2409_s10 = inlined_call_operand.hbm [shape: f32[16,32], index: 10, kind: output, shape index: {}]  }
   0x1   :  { %16 = vsyncpa [#allocation4], 0  ;;  %s35_s15 = sshll.u32 %s2405_s6, 4  ;;  %s36_s15 = int_to_ptr.vmem [resolvable:$true] %s35_s15 }
   0x2   :  { %s2028_s16 = scalar_lea.vmem %s36_s15, 16  ;;  %p2033_p1 = scmp.lt.s32.totalorder %s36_s15, %s36_s15 }
   0x3   :  { %p2029_p0 = scmp.ne.s32.totalorder %s36_s15, %s2028_s16  ;;  %p2034_p2 = scmp.lt.s32.totalorder %s2028_s16, %s2028_s16 }
   0x5   :  { %p2035_p3 = por %p2034_p2, %p2033_p1 }
   0x7   :  { %p2036_p4 = pnand %p2035_p3, %p2029_p0 }
   0x9   :  { %2039 = shalt.err (!%p2036_p4)
}
   0xa   :  { %s2064_s17 = smov [#allocation3]  }
   0xb   :  { %38 = dma.vmem_to_smem %s36_s15, 16, %s2064_s17, [#allocation5]  }
   0xc   :  { %2060 = dma.done.wait [#allocation5], 16  }
   0xd   :  { %2061 = vsyncadd [#allocation5], 4294967280 }
   0xe   :  { %48 = sfence }
   0xf   :  { %v49_v0 = vld [vmem:[%s2399_s0] sm:$0xff]  ;;  %vm53_vm0 = vcmask 261120   ;;  %v50_v1 = vld [vmem:[%s2399_s0 + $0x8] sm:$0xff]  ;;  %v104_v14 = vld [vmem:[%s2402_s3 + $0x38] sm:$0xff]  ;;  %v2065_v18 = vmov 0.0   ;;  %s2066_s19 = smov 64   ;;  %v208_v42 = vlaneseq }
  0x10   :  { %v54_v2 = vsel %vm53_vm0, %v49_v0, 0.0  ;;  %v57_v3 = vsel %vm53_vm0, %v50_v1, 0.0  ;;  %v103_v15 = vld [vmem:[%s2402_s3 + $0x30] sm:$0xff]  ;;  %v102_v16 = vld [vmem:[%s2402_s3 + $0x28] sm:$0xff]  ;;  %135 = vmatprep.subr.mxu0 %v104_v14  ;;  %v101_v17 = vld [vmem:[%s2402_s3 + $0x20] sm:$0xff]  ;;  %175 = vmatprep.mubr.f32.mxu0 %v2065_v18  ;;  %vm2067_vm1 = vmmov 0  }
  0x11   :  { %55 = vadd.xlane.f32.xlu0 %v54_v2  ;;  %136 = vmatpush1.msra.mxu0 %v103_v15  ;;  %v100_v19 = vld [vmem:[%s2402_s3 + $0x18] sm:$0xff]  ;;  %v99_v20 = vld [vmem:[%s2402_s3 + $0x10] sm:$0xff]  ;;  %v98_v21 = vld [vmem:[%s2402_s3 + $0x8] sm:$0xff]  ;;  %v209_v43 = vshrl.u32 %v208_v42, 7  ;;  %vm244_vm4 = vcmask 130048   ;;  %vm397_vm6 = vcmask 64512  }
  0x12   :  { %1873 = vmatprep.subr.mxu1 %v2065_v18  ;;  %137 = vmatprep.subr.mxu0 %v102_v16  ;;  %v97_v22 = vld [vmem:[%s2402_s3] sm:$0xff]  ;;  %s2068_s6 = smov 112   ;;  %s1799_s0 = sld [smem:[#allocation3 + $0x1]]  ;;  %vm912_vm7 = vcmask 261248   ;;  %vm1257_vm8 = vcmask 392448   ;;  %vm1602_vm9 = vcmask 523648  }
  0x13   :  { %138 = vmatpush1.msra.mxu0 %v101_v17  ;;  %v1788_v30 = vld [vmem:[%s2400_s1] ss:$0 sm:$0xff]  ;;  %1875 = vmatprep.mubr.msk.f32.mxu1 %vm2067_vm1, %v2065_v18  ;;  %v220_v46 = vsub.s32 0, %v209_v43  ;;  %vm210_vm2 = vcmp.lt.s32.totalorder %v209_v43, 1  ;;  %vm213_vm3 = vcmp.eq.s32.totalorder %v209_v43, 0  ;;  %s2069_s21 = smov 96  }
  0x14   :  { %139 = vmatprep.subr.mxu0 %v100_v19  ;;  %v1789_v32 = vld [vmem:[%s2401_s2] ss:$0 sm:$0xff]  ;;  %s1806_s22 = sld [smem:[#allocation3 + $0x2]]  ;;  %s2070_s23 = smov 80   ;;  %vm1645_vm10 = vcmask 523264  }
  0x15   :  { %58 = vadd.xlane.f32.xlu0 %v57_v3  ;;  %140 = vmatpush1.msra.mxu0 %v99_v20  ;;  %v197_v44 = vld [vmem:[%s2403_s4] sm:$0x1]  ;;  %v236_v3 = vand.u32 127, %v208_v42  ;;  %s1813_s24 = sld [smem:[#allocation3 + $0x3]]  ;;  %s2071_s25 = smov 16  }
  0x16   :  { %141 = vmatprep.subr.mxu0 %v98_v21  ;;  %v216_v45 = vsub.f32 1.0, %v197_v44  ;;  %v229_v51 = vrot.slane %v197_v44, %v220_v46  ;;  %v1792_v61 = vld [vmem:[%s2404_s5] ss:$0 sm:$0xff]  ;;  %s240_s5 = sld [smem:[#allocation3]]  ;;  %s2072_s26 = smov 32  }
  0x17   :  { %142 = vmatpush1.msra.mxu0 %v97_v22  ;;  %vm237_vm5 = vcmp.gt.s32.totalorder %v236_v3, %v209_v43  ;;  %s2073_s27 = smov 48  }
  0x18   :  { %1868 = vmatprep.subr.mxu0 %v2065_v18  ;;  %v221_v48 = vrot.slane %v216_v45, %v220_v46 }
  0x9a   :  { %v56_v4 = vpop.xlane.xlu0 %55 }
  0x9b   :  { %v61_v5 = vmul.f32 0.03125, %v56_v4  ;;  %v2223_v4 = vcvt.s32.f32 %v236_v3 }
  0x9d   :  { %v63_v6 = vsub.f32 %v49_v0, %v61_v5  ;;  %v241_v5 = vstv %s240_s5 }
  0x9e   :  { %v59_v7 = vpop.xlane.xlu0 %58 }
  0x9f   :  { %v62_v8 = vmul.f32 0.03125, %v59_v7  ;;  %v65_v9 = vmul.f32 %v63_v6, %v63_v6  ;;  %v2227_v7 = vsel %vm237_vm5, -1e+10, %v2065_v18 }
  0xa1   :  { %v64_v10 = vsub.f32 %v50_v1, %v62_v8  ;;  %v67_v11 = vsel %vm53_vm0, %v65_v9, 0.0 }
  0xa2   :  { %68 = vadd.xlane.f32.xlu1 %v67_v11 }
  0xa3   :  { %v66_v12 = vmul.f32 %v64_v10, %v64_v10 }
  0xa5   :  { %v70_v13 = vsel %vm53_vm0, %v66_v12, 0.0 }
  0xa6   :  { %71 = vadd.xlane.f32.xlu1 %v70_v13 }
 0x12b   :  { %v69_v23 = vpop.xlane.xlu1 %68 }
 0x12c   :  { %v73_v24 = vmul.f32 0.03125, %v69_v23 }
 0x12e   :  { %v75_v25 = vadd.f32 1e-05, %v73_v24 }
 0x12f   :  { %v72_v26 = vpop.xlane.xlu1 %71 }
 0x130   :  { %1980 = vrsqrt.f32 %v75_v25  ;;  %v74_v27 = vmul.f32 0.03125, %v72_v26 }
 0x132   :  { %v76_v28 = vadd.f32 1e-05, %v74_v27 }
 0x134   :  { %1982 = vrsqrt.f32 %v76_v28 }
 0x13d   :  { %v1981_v29 = vpop.eup %1980 }
 0x13e   :  { %v79_v31 = vmul.f32 %v1981_v29, %v63_v6  ;;  %v242_v6 = vmul.f32 %v241_v5, %v2223_v4 }
 0x140   :  { %v87_v33 = vmul.f32 %v1788_v30, %v79_v31  ;;  %v243_v8 = vadd.f32 %v242_v6, %v2227_v7 }
 0x141   :  { %v1983_v34 = vpop.eup %1982 }
 0x142   :  { %v95_v35 = vadd.f32 %v1789_v32, %v87_v33  ;;  %v80_v36 = vmul.f32 %v1983_v34, %v64_v10 }
 0x144   :  { %1790 = vmatmul.mubr.msk.f32.vlgmr.msra.gmra.mxu0 %vm53_vm0, %v95_v35  ;;  %v88_v37 = vmul.f32 %v1788_v30, %v80_v36 }
 0x145   :  { %181 = vmatprep.mubr.f32.mxu0 %v2065_v18 }
 0x146   :  { %v96_v38 = vadd.f32 %v1789_v32, %v88_v37 }
 0x148   :  { %1791 = vmatmul.mubr.msk.f32.gmra.mxu0 %vm53_vm0, %v96_v38  ;;  %v569_v38 = vstv %s1799_s0  ;;  %s2074_s0 = smov [#allocation6]  }
 0x149   :  { %1870 = vmatprep.mubr.msk.f32.mxu0 %vm2067_vm1, %v2065_v18 }
 0x204   :  { %v177_v39 = vpop.f32.mrf.mxu0 }
 0x205   :  { %200 = vrot.lane.b32.xlu0 %v177_v39, %s2066_s19  ;;  %v2203_v0 = vmul.f32 %v1792_v61, %v177_v39  ;;  %v570_v39 = vmul.f32 %v569_v38, %v2223_v4 }
 0x206   :  { %v2184_v40 = vpop.f32.mrf.mxu0 }
 0x207   :  { %v571_v43 = vadd.f32 %v570_v39, %v2227_v7 }
 0x208   :  { %v183_v41 = vpop.f32.mrf.mxu0 }
 0x209   :  { %202 = vrot.lane.b32.xlu1 %v183_v41, %s2066_s19  ;;  %v2205_v1 = vmul.f32 %v1792_v61, %v183_v41 }
 0x20a   :  { %v2209_v2 = vpop.f32.mrf.mxu0 }
 0x277   :  { %v201_v47 = vpop.permute.xlu0 %200 }
 0x278   :  { %v206_v50 = vrot.slane %v201_v47, 7  ;;  %v223_v57 = vmul.f32 %v221_v48, %v201_v47 }
 0x27b   :  { %v203_v49 = vpop.permute.xlu1 %202 }
 0x27c   :  { %v207_v52 = vrot.slane %v203_v49, 7  ;;  %v224_v58 = vmul.f32 %v221_v48, %v203_v49 }
 0x27e   :  { %v211_v53 = vsel %vm210_vm2, %v206_v50, %v207_v52  ;;  %v212_v54 = vsel %vm210_vm2, %v207_v52, %v206_v50 }
 0x27f   :  { %v214_v55 = vsel %vm213_vm3, 0.0, %v212_v54  ;;  %v215_v56 = vsel %vm213_vm3, 0.0, %v211_v53 }
 0x280   :  { %v231_v59 = vmul.f32 %v229_v51, %v214_v55  ;;  %v232_v60 = vmul.f32 %v229_v51, %v215_v56 }
 0x282   :  { %v2195_v62 = vadd.f32 %v231_v59, %v223_v57  ;;  %v2197_v63 = vadd.f32 %v232_v60, %v224_v58 }
 0x284   :  { %1869 = vmatpush3.xpose.msk.msra.mxu0 %vm244_vm4, %v2195_v62  ;;  %1874 = vmatpush3.xpose.msk.msra.mxu1 %vm244_vm4, %v2197_v63 }
 0x285   :  { %1878 = vmatprep.subr.mxu1 %v2065_v18  ;;  %1883 = vmatprep.subr.mxu0 %v2065_v18 }
 0x287   :  { %1871 = vmatmul.mubr.msk.f32.vlgmr.msra.gmra.mxu0 %vm244_vm4, %v2203_v0  ;;  %1876 = vmatmul.mubr.msk.f32.vlgmr.msra.gmra.mxu1 %vm244_vm4, %v2205_v1 }
 0x288   :  { %1879 = vmatpush3.msra.mxu1 %v2184_v40  ;;  %1884 = vmatpush3.msra.mxu0 %v2209_v2 }
 0x289   :  { %1880 = vmatprep.mubr.msk.f32.mxu1 %vm2067_vm1, %v2065_v18  ;;  %1885 = vmatprep.mubr.msk.f32.mxu0 %vm2067_vm1, %v2065_v18 }
 0x28a   :  { %1888 = vmatprep.subr.mxu1 %v2065_v18  ;;  %1893 = vmatprep.subr.mxu0 %v2065_v18 }
 0x347   :  { %v317_v9 = vpop.f32.mrf.mxu0  ;;  %v393_v10 = vpop.f32.mrf.mxu1 }
 0x348   :  { %v318_v11 = vadd.f32 %v317_v9, %v243_v8  ;;  %v394_v12 = vadd.f32 %v393_v10, %v243_v8 }
 0x349   :  { %v1872_v13 = vpop.f32.mrf.mxu0  ;;  %v1877_v14 = vpop.f32.mrf.mxu1 }
 0x34a   :  { %v398_v15 = vsel %vm397_vm6, %v318_v11, -inf  ;;  %v401_v16 = vsel %vm397_vm6, %v394_v12, -inf }
 0x34b   :  { %399 = vmax.xlane.f32.xlu1 %v398_v15  ;;  %402 = vmax.xlane.f32.xlu0 %v401_v16 }
 0x35c   :  { %652 = vrot.lane.b32.xlu1 %v2197_v63, %s2068_s6 }
 0x360   :  { %572 = vrot.lane.b32.xlu1 %v2203_v0, %s2068_s6 }
 0x3d4   :  { %v400_v17 = vpop.xlane.xlu1 %399  ;;  %v403_v19 = vpop.xlane.xlu0 %402 }
 0x3d5   :  { %v404_v20 = vsub.f32 %v318_v11, %v400_v17  ;;  %v405_v21 = vsub.f32 %v394_v12, %v403_v19 }
 0x3d7   :  { %v406_v22 = vmul.f32 1.442695, %v404_v20  ;;  %v408_v23 = vmul.f32 1.442695, %v405_v21  ;;  %v916_v20 = vstv %s1806_s22 }
 0x3d8   :  { %v653_v28 = vpop.permute.xlu1 %652  ;;  %v917_v21 = vmul.f32 %v916_v20, %v2223_v4 }
 0x3d9   :  { %1984 = vpow2.f32 %v406_v22 }
 0x3da   :  { %1986 = vpow2.f32 %v408_v23  ;;  %v918_v23 = vadd.f32 %v917_v21, %v2227_v7 }
 0x3dc   :  { %v573_v29 = vpop.permute.xlu1 %572 }
 0x3e6   :  { %v1985_v24 = vpop.eup %1984 }
 0x3e7   :  { %v1987_v25 = vpop.eup %1986  ;;  %v410_v26 = vsel %vm397_vm6, %v1985_v24, 0.0 }
 0x3e8   :  { %411 = vadd.xlane.f32.xlu0 %v410_v26  ;;  %v413_v27 = vsel %vm397_vm6, %v1987_v25, 0.0 }
 0x3e9   :  { %414 = vadd.xlane.f32.xlu1 %v413_v27 }
 0x3fa   :  { %650 = vrot.lane.b32.xlu1 %v2205_v1, %s2068_s6 }
 0x3fe   :  { %574 = vrot.lane.b32.xlu0 %v2195_v62, %s2068_s6 }
 0x471   :  { %v412_v30 = vpop.xlane.xlu0 %411 }
 0x472   :  { %v415_v31 = vpop.xlane.xlu1 %414  ;;  %1988 = vrcp.f32 %v412_v30 }
 0x473   :  { %1990 = vrcp.f32 %v415_v31 }
 0x475   :  { %v575_v36 = vpop.permute.xlu0 %574 }
 0x476   :  { %v651_v37 = vpop.permute.xlu1 %650 }
 0x47f   :  { %v1989_v32 = vpop.eup %1988 }
 0x480   :  { %v1991_v33 = vpop.eup %1990  ;;  %v418_v34 = vmul.f32 %v1989_v32, %v1985_v24 }
 0x481   :  { %v419_v35 = vmul.f32 %v1991_v33, %v1987_v25 }
 0x482   :  { %1881 = vmatmul.mubr.msk.f32.vlgmr.msra.gmra.mxu1 %vm397_vm6, %v418_v34 }
 0x483   :  { %1886 = vmatmul.mubr.msk.f32.vlgmr.msra.gmra.mxu0 %vm397_vm6, %v419_v35  ;;  %1889 = vmatpush3.xpose.msk.msra.mxu1 %vm244_vm4, %v575_v36 }
 0x484   :  { %1894 = vmatpush3.xpose.msk.msra.mxu0 %vm244_vm4, %v653_v28  ;;  %1890 = vmatprep.mubr.msk.f32.mxu1 %vm2067_vm1, %v2065_v18 }
 0x485   :  { %1895 = vmatprep.mubr.msk.f32.mxu0 %vm2067_vm1, %v2065_v18  ;;  %1903 = vmatprep.subr.mxu0 %v2065_v18 }
 0x486   :  { %1891 = vmatmul.mubr.msk.f32.vlgmr.msra.gmra.mxu1 %vm244_vm4, %v573_v29  ;;  %1898 = vmatprep.subr.mxu1 %v2065_v18 }
 0x487   :  { %1896 = vmatmul.mubr.msk.f32.vlgmr.msra.gmra.mxu0 %vm244_vm4, %v651_v37  ;;  %1900 = vmatprep.mubr.msk.f32.mxu1 %vm2067_vm1, %v2065_v18 }
 0x488   :  { %1905 = vmatprep.mubr.msk.f32.mxu0 %vm2067_vm1, %v2065_v18 }
 0x542   :  { %v489_v41 = vpop.f32.mrf.mxu1 }
 0x543   :  { %566 = vst.msk [vmem:[#allocation2] sm:$0xff] %vm244_vm4, %v489_v41  ;;  %v562_v42 = vpop.f32.mrf.mxu0 }
 0x544   :  { %567 = vst.msk [vmem:[#allocation2 + $0x8] sm:$0xff] %vm244_vm4, %v562_v42  ;;  %v1882_v44 = vpop.f32.mrf.mxu1 }
 0x545   :  { %v1887_v45 = vpop.f32.mrf.mxu0 }
 0x546   :  { %v646_v46 = vpop.f32.mrf.mxu1 }
 0x547   :  { %v647_v47 = vadd.f32 %v646_v46, %v571_v43  ;;  %v724_v48 = vpop.f32.mrf.mxu0 }
 0x548   :  { %v725_v49 = vadd.f32 %v724_v48, %v571_v43  ;;  %v1892_v50 = vpop.f32.mrf.mxu1 }
 0x549   :  { %v1897_v51 = vpop.f32.mrf.mxu0  ;;  %v728_v52 = vsel %vm397_vm6, %v647_v47, -inf }
 0x54a   :  { %v731_v53 = vsel %vm397_vm6, %v725_v49, -inf  ;;  %729 = vmax.xlane.f32.xlu0 %v728_v52 }
 0x54b   :  { %732 = vmax.xlane.f32.xlu1 %v731_v53 }
 0x55c   :  { %828 = vrot.lane.b32.xlu1 %v2209_v2, %s2068_s6 }
 0x560   :  { %921 = vrot.lane.b32.xlu1 %v2195_v62, %s2069_s21  ;;  %751 = vrot.lane.b32.xlu0 %v2184_v40, %s2068_s6 }
 0x564   :  { %999 = vrot.lane.b32.xlu1 %v2197_v63, %s2069_s21 }
 0x568   :  { %997 = vrot.lane.b32.xlu1 %v2205_v1, %s2069_s21 }
 0x5d3   :  { %v730_v54 = vpop.xlane.xlu0 %729 }
 0x5d4   :  { %v733_v55 = vpop.xlane.xlu1 %732  ;;  %v734_v56 = vsub.f32 %v647_v47, %v730_v54  ;;  %v1261_v54 = vstv %s1813_s24 }
 0x5d5   :  { %v735_v57 = vsub.f32 %v725_v49, %v733_v55  ;;  %v1262_v55 = vmul.f32 %v1261_v54, %v2223_v4 }
 0x5d6   :  { %v736_v58 = vmul.f32 1.442695, %v734_v56 }
 0x5d7   :  { %v738_v59 = vmul.f32 1.442695, %v735_v57  ;;  %v752_v60 = vpop.permute.xlu0 %751  ;;  %v1263_v57 = vadd.f32 %v1262_v55, %v2227_v7 }
 0x5d8   :  { %1992 = vpow2.f32 %v736_v58  ;;  %v829_v61 = vpop.permute.xlu1 %828  ;;  %1899 = vmatpush3.msra.mxu1 %v752_v60 }
 0x5d9   :  { %1904 = vmatpush3.msra.mxu0 %v829_v61  ;;  %1908 = vmatprep.subr.mxu1 %v2065_v18  ;;  %1994 = vpow2.f32 %v738_v59 }
 0x5da   :  { %1913 = vmatprep.subr.mxu0 %v2065_v18 }
 0x5dc   :  { %v922_v11 = vpop.permute.xlu1 %921 }
 0x5e0   :  { %v1000_v15 = vpop.permute.xlu1 %999 }
 0x5e4   :  { %v998_v19 = vpop.permute.xlu1 %997 }
 0x5e5   :  { %v1993_v3 = vpop.eup %1992 }
 0x5e6   :  { %v740_v5 = vsel %vm397_vm6, %v1993_v3, 0.0  ;;  %v1995_v6 = vpop.eup %1994 }
 0x5e7   :  { %741 = vadd.xlane.f32.xlu0 %v740_v5  ;;  %v743_v8 = vsel %vm397_vm6, %v1995_v6, 0.0 }
 0x5eb   :  { %744 = vadd.xlane.f32.xlu0 %v743_v8 }
 0x601   :  { %919 = vrot.lane.b32.xlu0 %v2203_v0, %s2069_s21 }
 0x670   :  { %v742_v9 = vpop.xlane.xlu0 %741 }
 0x671   :  { %1996 = vrcp.f32 %v742_v9 }
 0x674   :  { %v745_v10 = vpop.xlane.xlu0 %744 }
 0x675   :  { %1998 = vrcp.f32 %v745_v10 }
 0x678   :  { %v920_v17 = vpop.permute.xlu0 %919 }
 0x67e   :  { %v1997_v12 = vpop.eup %1996 }
 0x67f   :  { %v748_v13 = vmul.f32 %v1997_v12, %v1993_v3 }
 0x681   :  { %1901 = vmatmul.mubr.msk.f32.vlgmr.msra.gmra.mxu1 %vm397_vm6, %v748_v13 }
 0x682   :  { %v1999_v14 = vpop.eup %1998  ;;  %1909 = vmatpush3.xpose.msk.msra.mxu1 %vm244_vm4, %v922_v11  ;;  %1910 = vmatprep.mubr.msk.f32.mxu1 %vm2067_vm1, %v2065_v18 }
 0x683   :  { %v749_v16 = vmul.f32 %v1999_v14, %v1995_v6  ;;  %1918 = vmatprep.subr.mxu1 %v2065_v18 }
 0x685   :  { %1906 = vmatmul.mubr.msk.f32.vlgmr.msra.gmra.mxu0 %vm397_vm6, %v749_v16  ;;  %1911 = vmatmul.mubr.msk.f32.vlgmr.msra.gmra.mxu1 %vm244_vm4, %v920_v17 }
 0x686   :  { %1914 = vmatpush3.xpose.msk.msra.mxu0 %vm244_vm4, %v1000_v15  ;;  %1915 = vmatprep.mubr.msk.f32.mxu0 %vm2067_vm1, %v2065_v18 }
 0x687   :  { %1923 = vmatprep.subr.mxu0 %v2065_v18  ;;  %1920 = vmatprep.mubr.msk.f32.mxu1 %vm2067_vm1, %v2065_v18 }
 0x689   :  { %1916 = vmatmul.mubr.msk.f32.vlgmr.msra.gmra.mxu0 %vm244_vm4, %v998_v19 }
 0x68a   :  { %1925 = vmatprep.mubr.msk.f32.mxu0 %vm2067_vm1, %v2065_v18 }
 0x741   :  { %v2297_v22 = vpop.f32.mrf.mxu1 }
 0x743   :  { %v1902_v24 = vpop.f32.mrf.mxu1 }
 0x745   :  { %v2300_v25 = vpop.f32.mrf.mxu0  ;;  %v993_v26 = vpop.f32.mrf.mxu1 }
 0x746   :  { %v994_v27 = vadd.f32 %v993_v26, %v918_v23 }
 0x747   :  { %v1907_v28 = vpop.f32.mrf.mxu0  ;;  %v1912_v29 = vpop.f32.mrf.mxu1 }
 0x748   :  { %v1075_v30 = vsel %vm397_vm6, %v994_v27, -inf }
 0x749   :  { %v1071_v31 = vpop.f32.mrf.mxu0  ;;  %1076 = vmax.xlane.f32.xlu0 %v1075_v30 }
 0x74a   :  { %v1072_v32 = vadd.f32 %v1071_v31, %v918_v23 }
 0x74b   :  { %v1917_v33 = vpop.f32.mrf.mxu0 }
 0x74c   :  { %v1078_v34 = vsel %vm397_vm6, %v1072_v32, -inf }
 0x74d   :  { %1079 = vmax.xlane.f32.xlu1 %v1078_v34 }
 0x75e   :  { %1173 = vrot.lane.b32.xlu1 %v2209_v2, %s2069_s21 }
 0x75f   :  { %1097 = vrot.lane.b32.xlu0 %v2184_v40, %s2069_s21  ;;  %s1776_s21 = sshll.u32 %s2074_s0, 4  ;;  %s1777_s21 = int_to_ptr.vmem [resolvable:$true] %s1776_s21 }
 0x760   :  { %s2040_s22 = scalar_lea.vmem %s1777_s21, 256  ;;  %p2045_p6 = scmp.lt.s32.totalorder %s1777_s21, %s1777_s21 }
 0x761   :  { %p2041_p5 = scmp.ne.s32.totalorder %s1777_s21, %s2040_s22  ;;  %p2046_p7 = scmp.lt.s32.totalorder %s2040_s22, %s2040_s22 }
 0x762   :  { %1266 = vrot.lane.b32.xlu1 %v2195_v62, %s2070_s23 }
 0x763   :  { %p2047_p8 = por %p2046_p7, %p2045_p6 }
 0x765   :  { %p2048_p9 = pnand %p2047_p8, %p2041_p5 }
 0x766   :  { %1344 = vrot.lane.b32.xlu1 %v2197_v63, %s2070_s23 }
 0x76a   :  { %1342 = vrot.lane.b32.xlu1 %v2205_v1, %s2070_s23 }
 0x7d2   :  { %v1077_v35 = vpop.xlane.xlu0 %1076 }
 0x7d3   :  { %v1081_v36 = vsub.f32 %v994_v27, %v1077_v35 }
 0x7d5   :  { %v1083_v37 = vmul.f32 1.442695, %v1081_v36 }
 0x7d6   :  { %v1080_v38 = vpop.xlane.xlu1 %1079  ;;  %v1098_v39 = vpop.permute.xlu0 %1097 }
 0x7d7   :  { %2000 = vpow2.f32 %v1083_v37  ;;  %v1082_v41 = vsub.f32 %v1072_v32, %v1080_v38  ;;  %1919 = vmatpush3.msra.mxu1 %v1098_v39  ;;  %v1638_v37 = vld [vmem:[%s2406_s7 + $0x38] sm:$0xff]  ;;  %v1637_v38 = vld [vmem:[%s2406_s7 + $0x30] sm:$0xff] }
 0x7d8   :  { %1928 = vmatprep.subr.mxu1 %v2065_v18 }
 0x7d9   :  { %v1085_v42 = vmul.f32 1.442695, %v1082_v41  ;;  %v1636_v41 = vld [vmem:[%s2406_s7 + $0x28] sm:$0xff] }
 0x7da   :  { %v1174_v43 = vpop.permute.xlu1 %1173 }
 0x7db   :  { %2002 = vpow2.f32 %v1085_v42  ;;  %1924 = vmatpush3.msra.mxu0 %v1174_v43  ;;  %v1635_v42 = vld [vmem:[%s2406_s7 + $0x20] sm:$0xff] }
 0x7dc   :  { %1933 = vmatprep.subr.mxu0 %v2065_v18 }
 0x7de   :  { %v1267_v47 = vpop.permute.xlu1 %1266 }
 0x7e2   :  { %v1345_v51 = vpop.permute.xlu1 %1344 }
 0x7e4   :  { %v2001_v62 = vpop.eup %2000 }
 0x7e5   :  { %v1087_v63 = vsel %vm397_vm6, %v2001_v62, 0.0 }
 0x7e6   :  { %1088 = vadd.xlane.f32.xlu0 %v1087_v63  ;;  %v1343_v53 = vpop.permute.xlu1 %1342  ;;  %v1633_v63 = vld [vmem:[%s2406_s7 + $0x10] sm:$0xff] }
 0x7e8   :  { %v2003_v1 = vpop.eup %2002 }
 0x7e9   :  { %v1090_v44 = vsel %vm397_vm6, %v2003_v1, 0.0 }
 0x7ea   :  { %1091 = vadd.xlane.f32.xlu0 %v1090_v44  ;;  %v1820_v44 = vmul.f32 -1.442695, %v2184_v40 }
 0x800   :  { %1264 = vrot.lane.b32.xlu0 %v2203_v0, %s2070_s23 }
 0x86f   :  { %v1089_v45 = vpop.xlane.xlu0 %1088 }
 0x870   :  { %2004 = vrcp.f32 %v1089_v45  ;;  %v1821_v45 = vmul.f32 -1.442695, %v2209_v2 }
 0x873   :  { %v1092_v46 = vpop.xlane.xlu0 %1091 }
 0x874   :  { %2006 = vrcp.f32 %v1092_v46 }
 0x877   :  { %v1265_v0 = vpop.permute.xlu0 %1264 }
 0x87d   :  { %v2005_v48 = vpop.eup %2004 }
 0x87e   :  { %v1095_v49 = vmul.f32 %v2005_v48, %v2001_v62  ;;  %v1634_v62 = vld [vmem:[%s2406_s7 + $0x18] sm:$0xff] }
 0x880   :  { %1921 = vmatmul.mubr.msk.f32.vlgmr.msra.gmra.mxu1 %vm397_vm6, %v1095_v49 }
 0x881   :  { %v2007_v50 = vpop.eup %2006  ;;  %1929 = vmatpush3.xpose.msk.msra.mxu1 %vm244_vm4, %v1267_v47  ;;  %1930 = vmatprep.mubr.msk.f32.mxu1 %vm2067_vm1, %v2065_v18 }
 0x882   :  { %v1096_v52 = vmul.f32 %v2007_v50, %v2003_v1  ;;  %1938 = vmatprep.subr.mxu1 %v2065_v18  ;;  %v1632_v50 = vld [vmem:[%s2406_s7 + $0x8] sm:$0xff] }
 0x884   :  { %1926 = vmatmul.mubr.msk.f32.vlgmr.msra.gmra.mxu0 %vm397_vm6, %v1096_v52  ;;  %1931 = vmatmul.mubr.msk.f32.vlgmr.msra.gmra.mxu1 %vm244_vm4, %v1265_v0 }
 0x885   :  { %1934 = vmatpush3.xpose.msk.msra.mxu0 %vm244_vm4, %v1345_v51  ;;  %1935 = vmatprep.mubr.msk.f32.mxu0 %vm2067_vm1, %v2065_v18  ;;  %v1631_v51 = vld [vmem:[%s2406_s7] sm:$0xff] }
 0x886   :  { %1943 = vmatprep.subr.mxu0 %v2065_v18  ;;  %1940 = vmatprep.mubr.msk.f32.mxu1 %vm2067_vm1, %v2065_v18 }
 0x888   :  { %1936 = vmatmul.mubr.msk.f32.vlgmr.msra.gmra.mxu0 %vm244_vm4, %v1343_v53 }
 0x889   :  { %1945 = vmatprep.mubr.msk.f32.mxu0 %vm2067_vm1, %v2065_v18 }
 0x940   :  { %v1169_v56 = vpop.f32.mrf.mxu1 }
 0x942   :  { %v1922_v58 = vpop.f32.mrf.mxu1 }
 0x944   :  { %v1245_v59 = vpop.f32.mrf.mxu0  ;;  %v1338_v60 = vpop.f32.mrf.mxu1 }
 0x945   :  { %v1339_v61 = vadd.f32 %v1338_v60, %v1263_v57 }
 0x946   :  { %v1927_v3 = vpop.f32.mrf.mxu0  ;;  %v1932_v5 = vpop.f32.mrf.mxu1 }
 0x947   :  { %v1420_v6 = vsel %vm397_vm6, %v1339_v61, -inf }
 0x948   :  { %v1416_v8 = vpop.f32.mrf.mxu0  ;;  %1421 = vmax.xlane.f32.xlu0 %v1420_v6 }
 0x949   :  { %v1417_v9 = vadd.f32 %v1416_v8, %v1263_v57 }
 0x94a   :  { %v1937_v10 = vpop.f32.mrf.mxu0 }
 0x94b   :  { %v1423_v18 = vsel %vm397_vm6, %v1417_v9, -inf }
 0x94c   :  { %1424 = vmax.xlane.f32.xlu1 %v1423_v18 }
 0x95d   :  { %1518 = vrot.lane.b32.xlu1 %v2209_v2, %s2070_s23 }
 0x961   :  { %906 = vrot.lane.b32.xlu1 %v2297_v22, %s2071_s25 }
 0x965   :  { %908 = vrot.lane.b32.xlu1 %v2300_v25, %s2071_s25 }
 0x969   :  { %1253 = vrot.lane.b32.xlu1 %v1245_v59, %s2072_s26 }
 0x9d1   :  { %v1422_v4 = vpop.xlane.xlu0 %1421 }
 0x9d2   :  { %v1426_v7 = vsub.f32 %v1339_v61, %v1422_v4 }
 0x9d4   :  { %v1428_v11 = vmul.f32 1.442695, %v1426_v7 }
 0x9d5   :  { %v1425_v12 = vpop.xlane.xlu1 %1424 }
 0x9d6   :  { %2008 = vpow2.f32 %v1428_v11  ;;  %v1427_v13 = vsub.f32 %v1417_v9, %v1425_v12 }
 0x9d8   :  { %v1430_v14 = vmul.f32 1.442695, %v1427_v13 }
 0x9d9   :  { %v1519_v15 = vpop.permute.xlu1 %1518 }
 0x9da   :  { %2010 = vpow2.f32 %v1430_v14  ;;  %1944 = vmatpush3.msra.mxu0 %v1519_v15 }
 0x9dd   :  { %v907_v16 = vpop.permute.xlu1 %906 }
 0x9de   :  { %913 = vst.msk [vmem:[#allocation2] sm:$0xff] %vm912_vm7, %v907_v16 }
 0x9e1   :  { %v909_v17 = vpop.permute.xlu1 %908 }
 0x9e2   :  { %914 = vst.msk [vmem:[#allocation2 + $0x8] sm:$0xff] %vm912_vm7, %v909_v17 }
 0x9e3   :  { %v2009_v19 = vpop.eup %2008 }
 0x9e4   :  { %v1432_v20 = vsel %vm397_vm6, %v2009_v19, 0.0 }
 0x9e5   :  { %v1254_v21 = vpop.permute.xlu1 %1253  ;;  %1433 = vadd.xlane.f32.xlu0 %v1432_v20 }
 0x9e6   :  { %1259 = vst.msk [vmem:[#allocation2 + $0x8] sm:$0xff] %vm1257_vm8, %v1254_v21  ;;  %v1824_v21 = vld [vmem:[%s2407_s8] ss:$0 sm:$0xff] }
 0x9e7   :  { %v2011_v22 = vpop.eup %2010 }
 0x9e8   :  { %v1435_v23 = vsel %vm397_vm6, %v2011_v22, 0.0 }
 0x9e9   :  { %1436 = vadd.xlane.f32.xlu0 %v1435_v23  ;;  %v1825_v23 = vld [vmem:[%s2408_s9] ss:$0 sm:$0xff] }
 0x9ff   :  { %1442 = vrot.lane.b32.xlu0 %v2184_v40, %s2070_s23 }
 0xa03   :  { %1251 = vrot.lane.b32.xlu0 %v1169_v56, %s2072_s26 }
 0xa6e   :  { %v1434_v24 = vpop.xlane.xlu0 %1433 }
 0xa6f   :  { %2012 = vrcp.f32 %v1434_v24 }
 0xa72   :  { %v1437_v25 = vpop.xlane.xlu0 %1436 }
 0xa73   :  { %2014 = vrcp.f32 %v1437_v25 }
 0xa74   :  { %2016 = vpow2.f32 %v1820_v44 }
 0xa75   :  { %2018 = vpow2.f32 %v1821_v45 }
 0xa76   :  { %v1443_v26 = vpop.permute.xlu0 %1442 }
 0xa77   :  { %1939 = vmatpush3.msra.mxu1 %v1443_v26 }
 0xa78   :  { %1948 = vmatprep.subr.mxu1 %v1638_v37 }
 0xa7a   :  { %v1252_v27 = vpop.permute.xlu0 %1251 }
 0xa7b   :  { %1258 = vst.msk [vmem:[#allocation2] sm:$0xff] %vm1257_vm8, %v1252_v27 }
 0xa7c   :  { %v2013_v28 = vpop.eup %2012 }
 0xa7d   :  { %v1440_v29 = vmul.f32 %v2013_v28, %v2009_v19 }
 0xa7f   :  { %1941 = vmatmul.mubr.msk.f32.vlgmr.msra.gmra.mxu1 %vm397_vm6, %v1440_v29 }
 0xa80   :  { %v2015_v30 = vpop.eup %2014  ;;  %1949 = vmatpush3.msra.mxu1 %v1638_v37 }
 0xa81   :  { %v1441_v31 = vmul.f32 %v2015_v30, %v2011_v22  ;;  %1950 = vmatprep.subr.mxu1 %v1637_v38  ;;  %v2017_v46 = vpop.eup %2016 }
 0xa82   :  { %1951 = vmatpush3.msra.mxu1 %v1637_v38  ;;  %v1611_v47 = vadd.f32 1.0, %v2017_v46  ;;  %v2019_v48 = vpop.eup %2018 }
 0xa83   :  { %1946 = vmatmul.mubr.msk.f32.vlgmr.msra.gmra.mxu0 %vm397_vm6, %v1441_v31  ;;  %1952 = vmatprep.subr.mxu1 %v1636_v41  ;;  %v1612_v49 = vadd.f32 1.0, %v2019_v48 }
 0xa84   :  { %1953 = vmatpush3.msra.mxu1 %v1636_v41  ;;  %2020 = vrcp.f32 %v1611_v47 }
 0xa85   :  { %1954 = vmatprep.subr.mxu1 %v1635_v42  ;;  %2022 = vrcp.f32 %v1612_v49 }
 0xa86   :  { %1955 = vmatpush3.msra.mxu1 %v1635_v42 }
 0xa87   :  { %1956 = vmatprep.subr.mxu1 %v1634_v62 }
 0xa88   :  { %1957 = vmatpush3.msra.mxu1 %v1634_v62 }
 0xa89   :  { %1958 = vmatprep.subr.mxu1 %v1633_v63 }
 0xa8a   :  { %1959 = vmatpush3.msra.mxu1 %v1633_v63 }
 0xa8b   :  { %1960 = vmatprep.subr.mxu1 %v1632_v50 }
 0xa8c   :  { %1961 = vmatpush3.msra.mxu1 %v1632_v50 }
 0xa8d   :  { %1962 = vmatprep.subr.mxu1 %v1631_v51 }
 0xa8e   :  { %1963 = vmatpush3.msra.mxu1 %v1631_v51 }
 0xa91   :  { %v2021_v52 = vpop.eup %2020 }
 0xa92   :  { %v1617_v0 = vmul.f32 %v2021_v52, %v2184_v40  ;;  %v2023_v53 = vpop.eup %2022 }
 0xa93   :  { %v1618_v56 = vmul.f32 %v2023_v53, %v2209_v2 }
 0xb3f   :  { %v1514_v32 = vpop.f32.mrf.mxu1 }
 0xb40   :  { %1596 = vrot.lane.b32.xlu0 %v1514_v32, %s2073_s27 }
 0xb41   :  { %v1942_v33 = vpop.f32.mrf.mxu1 }
 0xb43   :  { %v1590_v34 = vpop.f32.mrf.mxu0 }
 0xb44   :  { %1598 = vrot.lane.b32.xlu1 %v1590_v34, %s2073_s27 }
 0xb45   :  { %v1947_v35 = vpop.f32.mrf.mxu0 }
 0xbb2   :  { %v1597_v36 = vpop.permute.xlu0 %1596 }
 0xbb3   :  { %1603 = vst.msk [vmem:[#allocation2] sm:$0xff] %vm1602_vm9, %v1597_v36 }
 0xbb6   :  { %v1599_v39 = vpop.permute.xlu1 %1598 }
 0xbb7   :  { %1604 = vst.msk [vmem:[#allocation2 + $0x8] sm:$0xff] %vm1602_vm9, %v1599_v39 }
 0xbba   :  { %v1619_v43 = vld [vmem:[#allocation2] sm:$0xff] }
 0xbbb   :  { %1623 = vrot.lane.b32.xlu0 %v1619_v43, %s2066_s19 }
 0xbbe   :  { %v1620_v1 = vld [vmem:[#allocation2 + $0x8] sm:$0xff] }
 0xbbf   :  { %1625 = vrot.lane.b32.xlu1 %v1620_v1, %s2066_s19 }
 0xc2d   :  { %v1624_v54 = vpop.permute.xlu0 %1623 }
 0xc2e   :  { %v1629_v55 = vmul.f32 %v1624_v54, %v1617_v0 }
 0xc30   :  { %1641 = vrot.lane.b32.xlu0 %v1629_v55, %s2066_s19 }
 0xc31   :  { %v1626_v57 = vpop.permute.xlu1 %1625 }
 0xc32   :  { %v1630_v58 = vmul.f32 %v1626_v57, %v1618_v56 }
 0xc34   :  { %1643 = vrot.lane.b32.xlu1 %v1630_v58, %s2066_s19 }
 0xca2   :  { %v1642_v59 = vpop.permute.xlu0 %1641 }
 0xca3   :  { %1964 = vmatprep.mubr.msk.f32.mxu1 %vm1645_vm10, %v1642_v59 }
 0xca6   :  { %v1644_v60 = vpop.permute.xlu1 %1643 }
 0xca7   :  { %1965 = vmatmul.mubr.msk.f32.vlgmr.msra.gmra.mxu1 %vm1645_vm10, %v1644_v60 }
 0xd67   :  { %v1966_v61 = vpop.f32.mrf.mxu1 }
 0xd68   :  { %v1730_v3 = vsel %vm53_vm0, %v1966_v61, 0.0 }
 0xd69   :  { %1731 = vadd.xlane.f32.xlu1 %v1730_v3  ;;  %v1716_v40 = vpop.f32.mrf.mxu1 }
 0xd6a   :  { %v1727_v5 = vsel %vm53_vm0, %v1716_v40, 0.0 }
 0xd6b   :  { %1728 = vadd.xlane.f32.xlu0 %v1727_v5 }
 0xdf2   :  { %v1732_v6 = vpop.xlane.xlu1 %1731 }
 0xdf3   :  { %v1734_v8 = vmul.f32 0.03125, %v1732_v6 }
 0xdf4   :  { %v1729_v2 = vpop.xlane.xlu0 %1728 }
 0xdf5   :  { %v1733_v9 = vmul.f32 0.03125, %v1729_v2  ;;  %v1736_v10 = vsub.f32 %v1966_v61, %v1734_v8 }
 0xdf7   :  { %v1735_v18 = vsub.f32 %v1716_v40, %v1733_v9  ;;  %v1738_v11 = vmul.f32 %v1736_v10, %v1736_v10 }
 0xdf9   :  { %v1737_v4 = vmul.f32 %v1735_v18, %v1735_v18  ;;  %v1742_v12 = vsel %vm53_vm0, %v1738_v11, 0.0 }
 0xdfb   :  { %v1739_v7 = vsel %vm53_vm0, %v1737_v4, 0.0 }
 0xdfc   :  { %1740 = vadd.xlane.f32.xlu0 %v1739_v7 }
 0xe00   :  { %1743 = vadd.xlane.f32.xlu0 %v1742_v12 }
 0xe85   :  { %v1741_v13 = vpop.xlane.xlu0 %1740 }
 0xe86   :  { %v1745_v14 = vmul.f32 0.03125, %v1741_v13 }
 0xe88   :  { %v1747_v15 = vadd.f32 1e-05, %v1745_v14 }
 0xe89   :  { %v1744_v16 = vpop.xlane.xlu0 %1743 }
 0xe8a   :  { %2024 = vrsqrt.f32 %v1747_v15  ;;  %v1746_v17 = vmul.f32 0.03125, %v1744_v16 }
 0xe8c   :  { %v1748_v19 = vadd.f32 1e-05, %v1746_v17 }
 0xe8e   :  { %2026 = vrsqrt.f32 %v1748_v19 }
 0xe97   :  { %v2025_v20 = vpop.eup %2024 }
 0xe98   :  { %v1751_v22 = vmul.f32 %v2025_v20, %v1735_v18 }
 0xe9a   :  { %v1759_v24 = vmul.f32 %v1824_v21, %v1751_v22 }
 0xe9b   :  { %v2027_v25 = vpop.eup %2026 }
 0xe9c   :  { %v1752_v26 = vmul.f32 %v2027_v25, %v1736_v10  ;;  %v1767_v27 = vadd.f32 %v1825_v23, %v1759_v24 }
 0xe9e   :  { %v1760_v28 = vmul.f32 %v1824_v21, %v1752_v26  ;;  %1769 = vst.msk [vmem:[#allocation6] sm:$0xff] %vm53_vm0, %v1767_v27 }
 0xea0   :  { %v1768_v29 = vadd.f32 %v1825_v23, %v1760_v28 }
 0xea2   :  { %1770 = vst.msk [vmem:[#allocation6 + $0x8] sm:$0xff] %vm53_vm0, %v1768_v29 }
 0xea3   :  { %2051 = shalt.err (!%p2048_p9)
}
 0xea4   :  { %s2075_s8 = smov 128   ;;  %s2076_s9 = smov 8  }
 0xea5   :  { %1782 = dma.vmem_to_hbm [thread:$0]  %s1777_s21, 256, %s2409_s10, [#allocation4], %s2075_s8, %s2075_s8, %s2076_s9  }
 0xea6   :  { %2062 = dma.done.wait [#allocation4], 256  }
 0xea7   :  { %2063 = vsyncadd [#allocation4], 4294967040 }
 0xea8   :  { %1786 = vsyncpa [#allocation4], 1 }
 0xea9   :  { %1787 = vsyncpa [#allocation5], 1 }

</bundles_post_ra>
